<compile_context>
chip_gen: v7x
topology: tpu7x:2x2x1
jax: 0.10.0
libtpu: 0.0.40
codegen_flags: <defaults>
</compile_context>

<pallas_src>
import functools

import jax
import jax.numpy as jnp
from jax.experimental import pallas as pl
from jax.experimental.pallas import tpu as pltpu


def _gru_recurrence_kernel(gx_ref, whh_ref, bhn_ref, h_ref, *, seq_len, hp):
    """Full GRU recurrence over `seq_len` steps in a single invocation.

    gx_ref : (T, B, 3*Hp)  precomputed x_t @ W_i{r,z,n}^T + b_i{r,z,n}
                           (+ b_h{r,z} folded in), each gate block padded
                           to Hp lanes.
    whh_ref: (Hp, 3*Hp)    combined, lane-padded W_h{r,z,n}^T (right-multiply).
    bhn_ref: (1, Hp)       b_hn (must stay inside the r-gated term).
    h_ref  : (B, Hp)       output: final hidden state (valid columns [:H]).
    """
    whh = whh_ref[...]                                   # loop-invariant
    bhn = bhn_ref[...]

    def step(t, h):
        gx_t = gx_ref[t]                                 # (B, 3*Hp)
        # Single fused recurrent matmul for all three gates.
        gh = jnp.dot(h, whh, preferred_element_type=jnp.float32)   # (B, 3*Hp)
        # Lane-boundary-aligned static slices (each Hp = 128 wide).
        r = jax.nn.sigmoid(gx_t[:, 0:hp] + gh[:, 0:hp])
        z = jax.nn.sigmoid(gx_t[:, hp:2 * hp] + gh[:, hp:2 * hp])
        # PyTorch GRU: b_hn sits inside the r-gated term.
        n = jnp.tanh(gx_t[:, 2 * hp:3 * hp] + r * (gh[:, 2 * hp:3 * hp] + bhn))
        # h' = (1-z)*n + z*h  ==  n + z*(h - n)
        return n + z * (h - n)

    h0 = jnp.zeros(h_ref.shape, jnp.float32)
    # Full unroll is fine at T=8; use partial unroll (4..8) at real T.
    h_ref[...] = jax.lax.fori_loop(0, seq_len, step, h0, unroll=True)


def gru_sentiment_forward(features, params):
    """features: (B, T, input_dim) float32. Returns softmax probs of sample 0."""
    B, T, D = features.shape
    H = params["w_hh"].shape[0] // 3
    HP = max(128, ((H + 127) // 128) * 128)              # lane-padded gate width

    f32 = jnp.float32
    w_ih = params["w_ih"].astype(f32)                     # (3H, D)
    w_hh = params["w_hh"].astype(f32)                     # (3H, H)
    b_ih = params["b_ih"].astype(f32)                     # (3H,)
    b_hh = params["b_hh"].astype(f32)                     # (3H,)
    w_fc_t = jnp.transpose(params["w_fc"]).astype(f32)    # (H, O)
    b_fc = params["b_fc"].astype(f32)                     # (O,)

    # --- Hoisted input projection, emitted directly in (T, B, 3, H) layout ---
    # (time-major + gate axis come straight out of the einsum; no extra
    #  HBM round-trip transposes).
    w_ih_g = w_ih.reshape(3, H, D)
    gx = jnp.einsum("btd,ghd->tbgh", features.astype(f32), w_ih_g)  # (T,B,3,H)
    # Fold b_ih for all gates and b_hh for the r/z gates (b_hn stays in-kernel).
    gate_mask = jnp.array([1.0, 1.0, 0.0], f32)[:, None]            # (3,1)
    b_fold = b_ih.reshape(3, H) + b_hh.reshape(3, H) * gate_mask
    gx = gx + b_fold                                                 # (T,B,3,H)
    # Pad each gate block to HP lanes, then flatten gate axis into lanes.
    gx = jnp.pad(gx, ((0, 0), (0, 0), (0, 0), (0, HP - H)))
    gx = gx.reshape(T, B, 3 * HP)                                    # (T,B,3*HP)

    # --- Combined, lane-padded recurrent weight (right-multiply form) ---
    whh_t = jnp.transpose(w_hh.reshape(3, H, H), (0, 2, 1))          # (3,H,H)=W_hg^T
    whh_pad = jnp.pad(whh_t, ((0, 0), (0, HP - H), (0, HP - H)))     # (3,HP,HP)
    whh_comb = jnp.transpose(whh_pad, (1, 0, 2)).reshape(HP, 3 * HP)  # (HP,3*HP)

    bhn = jnp.pad(b_hh[2 * H:3 * H], (0, HP - H)).reshape(1, HP)     # (1,HP)

    kernel = functools.partial(_gru_recurrence_kernel, seq_len=T, hp=HP)

    h_pad = pl.pallas_call(
        kernel,
        out_shape=jax.ShapeDtypeStruct((B, HP), jnp.float32),
        grid=(1,),                                       # single invocation
        in_specs=[
            pl.BlockSpec((T, B, 3 * HP), lambda i: (0, 0, 0)),   # gx
            pl.BlockSpec((HP, 3 * HP), lambda i: (0, 0)),        # W_hh combined
            pl.BlockSpec((1, HP), lambda i: (0, 0)),             # b_hn
        ],
        out_specs=pl.BlockSpec((B, HP), lambda i: (0, 0)),
        compiler_params=pltpu.CompilerParams(
            dimension_semantics=("arbitrary",)),
    )(gx, whh_comb, bhn)

    h_last = h_pad[:, :H]                                # drop lane padding

    # Tiny FC + softmax epilogue (O=4) stays in plain XLA per perf review.
    logits = h_last @ w_fc_t + b_fc                      # (B, O)
    probs = jax.nn.softmax(logits, axis=1)
    return probs[0]                                      # matches `output[0]`


def _reference_forward(features, params):
    """Pure-JAX reference (scan GRU + linear + softmax) for validation."""
    H = params["w_hh"].shape[0] // 3
    w_ih_t = jnp.transpose(params["w_ih"])
    w_hh_t = jnp.transpose(params["w_hh"])

    def step(h, x_t):
        gx = x_t @ w_ih_t + params["b_ih"]
        gh = h @ w_hh_t + params["b_hh"]
        r = jax.nn.sigmoid(gx[:, :H] + gh[:, :H])
        z = jax.nn.sigmoid(gx[:, H:2 * H] + gh[:, H:2 * H])
        n = jnp.tanh(gx[:, 2 * H:] + r * gh[:, 2 * H:])
        h_new = (1.0 - z) * n + z * h
        return h_new, None

    B = features.shape[0]
    h0 = jnp.zeros((B, H), jnp.float32)
    h_last, _ = jax.lax.scan(step, h0, jnp.transpose(features, (1, 0, 2)))
    logits = h_last @ jnp.transpose(params["w_fc"]) + params["b_fc"]
    return jax.nn.softmax(logits, axis=1)[0]


def init_params(key, input_dim, hidden_dim, output_dim):
    """Deterministic synthetic init mirroring the nn.GRU / nn.Linear shapes."""
    ks = jax.random.split(key, 6)
    s = 1.0 / jnp.sqrt(hidden_dim)
    return {
        "w_ih": jax.random.uniform(ks[0], (3 * hidden_dim, input_dim), jnp.float32, -s, s),
        "w_hh": jax.random.uniform(ks[1], (3 * hidden_dim, hidden_dim), jnp.float32, -s, s),
        "b_ih": jax.random.uniform(ks[2], (3 * hidden_dim,), jnp.float32, -s, s),
        "b_hh": jax.random.uniform(ks[3], (3 * hidden_dim,), jnp.float32, -s, s),
        "w_fc": jax.random.uniform(ks[4], (output_dim, hidden_dim), jnp.float32, -s, s),
        "b_fc": jax.random.uniform(ks[5], (output_dim,), jnp.float32, -s, s),
    }


if __name__ == "__main__":
    B, T, INPUT_DIM, HIDDEN_DIM, OUTPUT_DIM = 2, 8, 32, 32, 4

    key = jax.random.PRNGKey(0)
    k_feat, k_par = jax.random.split(key)
    # Stand-in for speechlm(x, features_only=True)['x']  (see TODO above).
    features = jax.random.normal(k_feat, (B, T, INPUT_DIM), jnp.float32)
    params = init_params(k_par, INPUT_DIM, HIDDEN_DIM, OUTPUT_DIM)

    out = gru_sentiment_forward(features, params)
    out = jax.block_until_ready(out)

    ref = _reference_forward(features, params)
    assert out.shape == (OUTPUT_DIM,)
    assert jnp.allclose(out, ref, atol=1e-5, rtol=1e-5), (out, ref)

    print("KERNEL_OK")
</pallas_src>

<mosaic_0001>
module attributes {stable_mosaic.version = 11 : i64} {
  func.func @_gru_recurrence_kernel(%arg0: i32, %arg1: memref<8x2x384xf32, #tpu.memory_space<vmem>>, %arg2: memref<128x384xf32, #tpu.memory_space<vmem>>, %arg3: memref<1x128xf32, #tpu.memory_space<vmem>>, %arg4: memref<2x128xf32, #tpu.memory_space<vmem>>) attributes {dimension_semantics = [#tpu.dimension_semantics<arbitrary>], iteration_bounds = array<i64: 1>, scalar_prefetch = 0 : i64, scratch_operands = 0 : i64, tpu.core_type = #tpu.core_type<tc>, window_params = [{pipeline_mode = #tpu.pipeline_mode<synchronous>, transform_indices = @transform_0, window_bounds = array<i64: 8, 2, 384>}, {pipeline_mode = #tpu.pipeline_mode<synchronous>, transform_indices = @transform_1, window_bounds = array<i64: 128, 384>}, {pipeline_mode = #tpu.pipeline_mode<synchronous>, transform_indices = @transform_2, window_bounds = array<i64: 1, 128>}, {pipeline_mode = #tpu.pipeline_mode<synchronous>, transform_indices = @transform_3, window_bounds = array<i64: 2, 128>}]} {
    %c0 = arith.constant 0 : index
    %c0_0 = arith.constant 0 : index
    %0 = vector.load %arg2[%c0, %c0_0] : memref<128x384xf32, #tpu.memory_space<vmem>>, vector<128x384xf32>
    %c0_1 = arith.constant 0 : index
    %c0_2 = arith.constant 0 : index
    %1 = vector.load %arg3[%c0_1, %c0_2] : memref<1x128xf32, #tpu.memory_space<vmem>>, vector<1x128xf32>
    %cst = arith.constant 0.000000e+00 : f32
    %2 = vector.broadcast %cst : f32 to vector<2x128xf32>
    %c0_i32 = arith.constant 0 : i32
    %3 = arith.index_cast %c0_i32 : i32 to index
    %c0_3 = arith.constant 0 : index
    %c0_4 = arith.constant 0 : index
    %4 = vector.load %arg1[%3, %c0_3, %c0_4] : memref<8x2x384xf32, #tpu.memory_space<vmem>>, vector<1x2x384xf32>
    %5 = vector.shape_cast %4 : vector<1x2x384xf32> to vector<2x384xf32>
    %cst_5 = arith.constant dense<0.000000e+00> : vector<2x384xf32>
    %6 = tpu.matmul %2, %0, %cst_5 {dimension_numbers = #tpu.dot_dimension_numbers<[1], [0], [0], [1], [0, 0, 1, 1], [], []>} : vector<2x128xf32>, vector<128x384xf32>, vector<2x384xf32> -> vector<2x384xf32>
    %7 = vector.extract_strided_slice %5 {offsets = [0, 0], sizes = [2, 128], strides = [1, 1]} : vector<2x384xf32> to vector<2x128xf32>
    %8 = vector.extract_strided_slice %6 {offsets = [0, 0], sizes = [2, 128], strides = [1, 1]} : vector<2x384xf32> to vector<2x128xf32>
    %9 = arith.addf %7, %8 : vector<2x128xf32>
    %10 = arith.negf %9 : vector<2x128xf32>
    %11 = math.exp %10 : vector<2x128xf32>
    %cst_6 = arith.constant 1.000000e+00 : f32
    %12 = vector.broadcast %cst_6 : f32 to vector<2x128xf32>
    %13 = arith.addf %12, %11 : vector<2x128xf32>
    %14 = arith.divf %12, %13 : vector<2x128xf32>
    %15 = vector.extract_strided_slice %5 {offsets = [0, 128], sizes = [2, 128], strides = [1, 1]} : vector<2x384xf32> to vector<2x128xf32>
    %16 = vector.extract_strided_slice %6 {offsets = [0, 128], sizes = [2, 128], strides = [1, 1]} : vector<2x384xf32> to vector<2x128xf32>
    %17 = arith.addf %15, %16 : vector<2x128xf32>
    %18 = arith.negf %17 : vector<2x128xf32>
    %19 = math.exp %18 : vector<2x128xf32>
    %cst_7 = arith.constant 1.000000e+00 : f32
    %20 = vector.broadcast %cst_7 : f32 to vector<2x128xf32>
    %21 = arith.addf %20, %19 : vector<2x128xf32>
    %22 = arith.divf %20, %21 : vector<2x128xf32>
    %23 = vector.extract_strided_slice %5 {offsets = [0, 256], sizes = [2, 128], strides = [1, 1]} : vector<2x384xf32> to vector<2x128xf32>
    %24 = vector.extract_strided_slice %6 {offsets = [0, 256], sizes = [2, 128], strides = [1, 1]} : vector<2x384xf32> to vector<2x128xf32>
    %25 = vector.broadcast %1 : vector<1x128xf32> to vector<2x128xf32>
    %26 = arith.addf %24, %25 : vector<2x128xf32>
    %27 = arith.mulf %14, %26 : vector<2x128xf32>
    %28 = arith.addf %23, %27 : vector<2x128xf32>
    %29 = math.tanh %28 : vector<2x128xf32>
    %30 = arith.subf %2, %29 : vector<2x128xf32>
    %31 = arith.mulf %22, %30 : vector<2x128xf32>
    %32 = arith.addf %29, %31 : vector<2x128xf32>
    %c1_i32 = arith.constant 1 : i32
    %33 = arith.index_cast %c1_i32 : i32 to index
    %c0_8 = arith.constant 0 : index
    %c0_9 = arith.constant 0 : index
    %34 = vector.load %arg1[%33, %c0_8, %c0_9] : memref<8x2x384xf32, #tpu.memory_space<vmem>>, vector<1x2x384xf32>
    %35 = vector.shape_cast %34 : vector<1x2x384xf32> to vector<2x384xf32>
    %cst_10 = arith.constant dense<0.000000e+00> : vector<2x384xf32>
    %36 = tpu.matmul %32, %0, %cst_10 {dimension_numbers = #tpu.dot_dimension_numbers<[1], [0], [0], [1], [0, 0, 1, 1], [], []>} : vector<2x128xf32>, vector<128x384xf32>, vector<2x384xf32> -> vector<2x384xf32>
    %37 = vector.extract_strided_slice %35 {offsets = [0, 0], sizes = [2, 128], strides = [1, 1]} : vector<2x384xf32> to vector<2x128xf32>
    %38 = vector.extract_strided_slice %36 {offsets = [0, 0], sizes = [2, 128], strides = [1, 1]} : vector<2x384xf32> to vector<2x128xf32>
    %39 = arith.addf %37, %38 : vector<2x128xf32>
    %40 = arith.negf %39 : vector<2x128xf32>
    %41 = math.exp %40 : vector<2x128xf32>
    %cst_11 = arith.constant 1.000000e+00 : f32
    %42 = vector.broadcast %cst_11 : f32 to vector<2x128xf32>
    %43 = arith.addf %42, %41 : vector<2x128xf32>
    %44 = arith.divf %42, %43 : vector<2x128xf32>
    %45 = vector.extract_strided_slice %35 {offsets = [0, 128], sizes = [2, 128], strides = [1, 1]} : vector<2x384xf32> to vector<2x128xf32>
    %46 = vector.extract_strided_slice %36 {offsets = [0, 128], sizes = [2, 128], strides = [1, 1]} : vector<2x384xf32> to vector<2x128xf32>
    %47 = arith.addf %45, %46 : vector<2x128xf32>
    %48 = arith.negf %47 : vector<2x128xf32>
    %49 = math.exp %48 : vector<2x128xf32>
    %cst_12 = arith.constant 1.000000e+00 : f32
    %50 = vector.broadcast %cst_12 : f32 to vector<2x128xf32>
    %51 = arith.addf %50, %49 : vector<2x128xf32>
    %52 = arith.divf %50, %51 : vector<2x128xf32>
    %53 = vector.extract_strided_slice %35 {offsets = [0, 256], sizes = [2, 128], strides = [1, 1]} : vector<2x384xf32> to vector<2x128xf32>
    %54 = vector.extract_strided_slice %36 {offsets = [0, 256], sizes = [2, 128], strides = [1, 1]} : vector<2x384xf32> to vector<2x128xf32>
    %55 = vector.broadcast %1 : vector<1x128xf32> to vector<2x128xf32>
    %56 = arith.addf %54, %55 : vector<2x128xf32>
    %57 = arith.mulf %44, %56 : vector<2x128xf32>
    %58 = arith.addf %53, %57 : vector<2x128xf32>
    %59 = math.tanh %58 : vector<2x128xf32>
    %60 = arith.subf %32, %59 : vector<2x128xf32>
    %61 = arith.mulf %52, %60 : vector<2x128xf32>
    %62 = arith.addf %59, %61 : vector<2x128xf32>
    %c2_i32 = arith.constant 2 : i32
    %63 = arith.index_cast %c2_i32 : i32 to index
    %c0_13 = arith.constant 0 : index
    %c0_14 = arith.constant 0 : index
    %64 = vector.load %arg1[%63, %c0_13, %c0_14] : memref<8x2x384xf32, #tpu.memory_space<vmem>>, vector<1x2x384xf32>
    %65 = vector.shape_cast %64 : vector<1x2x384xf32> to vector<2x384xf32>
    %cst_15 = arith.constant dense<0.000000e+00> : vector<2x384xf32>
    %66 = tpu.matmul %62, %0, %cst_15 {dimension_numbers = #tpu.dot_dimension_numbers<[1], [0], [0], [1], [0, 0, 1, 1], [], []>} : vector<2x128xf32>, vector<128x384xf32>, vector<2x384xf32> -> vector<2x384xf32>
    %67 = vector.extract_strided_slice %65 {offsets = [0, 0], sizes = [2, 128], strides = [1, 1]} : vector<2x384xf32> to vector<2x128xf32>
    %68 = vector.extract_strided_slice %66 {offsets = [0, 0], sizes = [2, 128], strides = [1, 1]} : vector<2x384xf32> to vector<2x128xf32>
    %69 = arith.addf %67, %68 : vector<2x128xf32>
    %70 = arith.negf %69 : vector<2x128xf32>
    %71 = math.exp %70 : vector<2x128xf32>
    %cst_16 = arith.constant 1.000000e+00 : f32
    %72 = vector.broadcast %cst_16 : f32 to vector<2x128xf32>
    %73 = arith.addf %72, %71 : vector<2x128xf32>
    %74 = arith.divf %72, %73 : vector<2x128xf32>
    %75 = vector.extract_strided_slice %65 {offsets = [0, 128], sizes = [2, 128], strides = [1, 1]} : vector<2x384xf32> to vector<2x128xf32>
    %76 = vector.extract_strided_slice %66 {offsets = [0, 128], sizes = [2, 128], strides = [1, 1]} : vector<2x384xf32> to vector<2x128xf32>
    %77 = arith.addf %75, %76 : vector<2x128xf32>
    %78 = arith.negf %77 : vector<2x128xf32>
    %79 = math.exp %78 : vector<2x128xf32>
    %cst_17 = arith.constant 1.000000e+00 : f32
    %80 = vector.broadcast %cst_17 : f32 to vector<2x128xf32>
    %81 = arith.addf %80, %79 : vector<2x128xf32>
    %82 = arith.divf %80, %81 : vector<2x128xf32>
    %83 = vector.extract_strided_slice %65 {offsets = [0, 256], sizes = [2, 128], strides = [1, 1]} : vector<2x384xf32> to vector<2x128xf32>
    %84 = vector.extract_strided_slice %66 {offsets = [0, 256], sizes = [2, 128], strides = [1, 1]} : vector<2x384xf32> to vector<2x128xf32>
    %85 = vector.broadcast %1 : vector<1x128xf32> to vector<2x128xf32>
    %86 = arith.addf %84, %85 : vector<2x128xf32>
    %87 = arith.mulf %74, %86 : vector<2x128xf32>
    %88 = arith.addf %83, %87 : vector<2x128xf32>
    %89 = math.tanh %88 : vector<2x128xf32>
    %90 = arith.subf %62, %89 : vector<2x128xf32>
    %91 = arith.mulf %82, %90 : vector<2x128xf32>
    %92 = arith.addf %89, %91 : vector<2x128xf32>
    %c3_i32 = arith.constant 3 : i32
    %93 = arith.index_cast %c3_i32 : i32 to index
    %c0_18 = arith.constant 0 : index
    %c0_19 = arith.constant 0 : index
    %94 = vector.load %arg1[%93, %c0_18, %c0_19] : memref<8x2x384xf32, #tpu.memory_space<vmem>>, vector<1x2x384xf32>
    %95 = vector.shape_cast %94 : vector<1x2x384xf32> to vector<2x384xf32>
    %cst_20 = arith.constant dense<0.000000e+00> : vector<2x384xf32>
    %96 = tpu.matmul %92, %0, %cst_20 {dimension_numbers = #tpu.dot_dimension_numbers<[1], [0], [0], [1], [0, 0, 1, 1], [], []>} : vector<2x128xf32>, vector<128x384xf32>, vector<2x384xf32> -> vector<2x384xf32>
    %97 = vector.extract_strided_slice %95 {offsets = [0, 0], sizes = [2, 128], strides = [1, 1]} : vector<2x384xf32> to vector<2x128xf32>
    %98 = vector.extract_strided_slice %96 {offsets = [0, 0], sizes = [2, 128], strides = [1, 1]} : vector<2x384xf32> to vector<2x128xf32>
    %99 = arith.addf %97, %98 : vector<2x128xf32>
    %100 = arith.negf %99 : vector<2x128xf32>
    %101 = math.exp %100 : vector<2x128xf32>
    %cst_21 = arith.constant 1.000000e+00 : f32
    %102 = vector.broadcast %cst_21 : f32 to vector<2x128xf32>
    %103 = arith.addf %102, %101 : vector<2x128xf32>
    %104 = arith.divf %102, %103 : vector<2x128xf32>
    %105 = vector.extract_strided_slice %95 {offsets = [0, 128], sizes = [2, 128], strides = [1, 1]} : vector<2x384xf32> to vector<2x128xf32>
    %106 = vector.extract_strided_slice %96 {offsets = [0, 128], sizes = [2, 128], strides = [1, 1]} : vector<2x384xf32> to vector<2x128xf32>
    %107 = arith.addf %105, %106 : vector<2x128xf32>
    %108 = arith.negf %107 : vector<2x128xf32>
    %109 = math.exp %108 : vector<2x128xf32>
    %cst_22 = arith.constant 1.000000e+00 : f32
    %110 = vector.broadcast %cst_22 : f32 to vector<2x128xf32>
    %111 = arith.addf %110, %109 : vector<2x128xf32>
    %112 = arith.divf %110, %111 : vector<2x128xf32>
    %113 = vector.extract_strided_slice %95 {offsets = [0, 256], sizes = [2, 128], strides = [1, 1]} : vector<2x384xf32> to vector<2x128xf32>
    %114 = vector.extract_strided_slice %96 {offsets = [0, 256], sizes = [2, 128], strides = [1, 1]} : vector<2x384xf32> to vector<2x128xf32>
    %115 = vector.broadcast %1 : vector<1x128xf32> to vector<2x128xf32>
    %116 = arith.addf %114, %115 : vector<2x128xf32>
    %117 = arith.mulf %104, %116 : vector<2x128xf32>
    %118 = arith.addf %113, %117 : vector<2x128xf32>
    %119 = math.tanh %118 : vector<2x128xf32>
    %120 = arith.subf %92, %119 : vector<2x128xf32>
    %121 = arith.mulf %112, %120 : vector<2x128xf32>
    %122 = arith.addf %119, %121 : vector<2x128xf32>
    %c4_i32 = arith.constant 4 : i32
    %123 = arith.index_cast %c4_i32 : i32 to index
    %c0_23 = arith.constant 0 : index
    %c0_24 = arith.constant 0 : index
    %124 = vector.load %arg1[%123, %c0_23, %c0_24] : memref<8x2x384xf32, #tpu.memory_space<vmem>>, vector<1x2x384xf32>
    %125 = vector.shape_cast %124 : vector<1x2x384xf32> to vector<2x384xf32>
    %cst_25 = arith.constant dense<0.000000e+00> : vector<2x384xf32>
    %126 = tpu.matmul %122, %0, %cst_25 {dimension_numbers = #tpu.dot_dimension_numbers<[1], [0], [0], [1], [0, 0, 1, 1], [], []>} : vector<2x128xf32>, vector<128x384xf32>, vector<2x384xf32> -> vector<2x384xf32>
    %127 = vector.extract_strided_slice %125 {offsets = [0, 0], sizes = [2, 128], strides = [1, 1]} : vector<2x384xf32> to vector<2x128xf32>
    %128 = vector.extract_strided_slice %126 {offsets = [0, 0], sizes = [2, 128], strides = [1, 1]} : vector<2x384xf32> to vector<2x128xf32>
    %129 = arith.addf %127, %128 : vector<2x128xf32>
    %130 = arith.negf %129 : vector<2x128xf32>
    %131 = math.exp %130 : vector<2x128xf32>
    %cst_26 = arith.constant 1.000000e+00 : f32
    %132 = vector.broadcast %cst_26 : f32 to vector<2x128xf32>
    %133 = arith.addf %132, %131 : vector<2x128xf32>
    %134 = arith.divf %132, %133 : vector<2x128xf32>
    %135 = vector.extract_strided_slice %125 {offsets = [0, 128], sizes = [2, 128], strides = [1, 1]} : vector<2x384xf32> to vector<2x128xf32>
    %136 = vector.extract_strided_slice %126 {offsets = [0, 128], sizes = [2, 128], strides = [1, 1]} : vector<2x384xf32> to vector<2x128xf32>
    %137 = arith.addf %135, %136 : vector<2x128xf32>
    %138 = arith.negf %137 : vector<2x128xf32>
    %139 = math.exp %138 : vector<2x128xf32>
    %cst_27 = arith.constant 1.000000e+00 : f32
    %140 = vector.broadcast %cst_27 : f32 to vector<2x128xf32>
    %141 = arith.addf %140, %139 : vector<2x128xf32>
    %142 = arith.divf %140, %141 : vector<2x128xf32>
    %143 = vector.extract_strided_slice %125 {offsets = [0, 256], sizes = [2, 128], strides = [1, 1]} : vector<2x384xf32> to vector<2x128xf32>
    %144 = vector.extract_strided_slice %126 {offsets = [0, 256], sizes = [2, 128], strides = [1, 1]} : vector<2x384xf32> to vector<2x128xf32>
    %145 = vector.broadcast %1 : vector<1x128xf32> to vector<2x128xf32>
    %146 = arith.addf %144, %145 : vector<2x128xf32>
    %147 = arith.mulf %134, %146 : vector<2x128xf32>
    %148 = arith.addf %143, %147 : vector<2x128xf32>
    %149 = math.tanh %148 : vector<2x128xf32>
    %150 = arith.subf %122, %149 : vector<2x128xf32>
    %151 = arith.mulf %142, %150 : vector<2x128xf32>
    %152 = arith.addf %149, %151 : vector<2x128xf32>
    %c5_i32 = arith.constant 5 : i32
    %153 = arith.index_cast %c5_i32 : i32 to index
    %c0_28 = arith.constant 0 : index
    %c0_29 = arith.constant 0 : index
    %154 = vector.load %arg1[%153, %c0_28, %c0_29] : memref<8x2x384xf32, #tpu.memory_space<vmem>>, vector<1x2x384xf32>
    %155 = vector.shape_cast %154 : vector<1x2x384xf32> to vector<2x384xf32>
    %cst_30 = arith.constant dense<0.000000e+00> : vector<2x384xf32>
    %156 = tpu.matmul %152, %0, %cst_30 {dimension_numbers = #tpu.dot_dimension_numbers<[1], [0], [0], [1], [0, 0, 1, 1], [], []>} : vector<2x128xf32>, vector<128x384xf32>, vector<2x384xf32> -> vector<2x384xf32>
    %157 = vector.extract_strided_slice %155 {offsets = [0, 0], sizes = [2, 128], strides = [1, 1]} : vector<2x384xf32> to vector<2x128xf32>
    %158 = vector.extract_strided_slice %156 {offsets = [0, 0], sizes = [2, 128], strides = [1, 1]} : vector<2x384xf32> to vector<2x128xf32>
    %159 = arith.addf %157, %158 : vector<2x128xf32>
    %160 = arith.negf %159 : vector<2x128xf32>
    %161 = math.exp %160 : vector<2x128xf32>
    %cst_31 = arith.constant 1.000000e+00 : f32
    %162 = vector.broadcast %cst_31 : f32 to vector<2x128xf32>
    %163 = arith.addf %162, %161 : vector<2x128xf32>
    %164 = arith.divf %162, %163 : vector<2x128xf32>
    %165 = vector.extract_strided_slice %155 {offsets = [0, 128], sizes = [2, 128], strides = [1, 1]} : vector<2x384xf32> to vector<2x128xf32>
    %166 = vector.extract_strided_slice %156 {offsets = [0, 128], sizes = [2, 128], strides = [1, 1]} : vector<2x384xf32> to vector<2x128xf32>
    %167 = arith.addf %165, %166 : vector<2x128xf32>
    %168 = arith.negf %167 : vector<2x128xf32>
    %169 = math.exp %168 : vector<2x128xf32>
    %cst_32 = arith.constant 1.000000e+00 : f32
    %170 = vector.broadcast %cst_32 : f32 to vector<2x128xf32>
    %171 = arith.addf %170, %169 : vector<2x128xf32>
    %172 = arith.divf %170, %171 : vector<2x128xf32>
    %173 = vector.extract_strided_slice %155 {offsets = [0, 256], sizes = [2, 128], strides = [1, 1]} : vector<2x384xf32> to vector<2x128xf32>
    %174 = vector.extract_strided_slice %156 {offsets = [0, 256], sizes = [2, 128], strides = [1, 1]} : vector<2x384xf32> to vector<2x128xf32>
    %175 = vector.broadcast %1 : vector<1x128xf32> to vector<2x128xf32>
    %176 = arith.addf %174, %175 : vector<2x128xf32>
    %177 = arith.mulf %164, %176 : vector<2x128xf32>
    %178 = arith.addf %173, %177 : vector<2x128xf32>
    %179 = math.tanh %178 : vector<2x128xf32>
    %180 = arith.subf %152, %179 : vector<2x128xf32>
    %181 = arith.mulf %172, %180 : vector<2x128xf32>
    %182 = arith.addf %179, %181 : vector<2x128xf32>
    %c6_i32 = arith.constant 6 : i32
    %183 = arith.index_cast %c6_i32 : i32 to index
    %c0_33 = arith.constant 0 : index
    %c0_34 = arith.constant 0 : index
    %184 = vector.load %arg1[%183, %c0_33, %c0_34] : memref<8x2x384xf32, #tpu.memory_space<vmem>>, vector<1x2x384xf32>
    %185 = vector.shape_cast %184 : vector<1x2x384xf32> to vector<2x384xf32>
    %cst_35 = arith.constant dense<0.000000e+00> : vector<2x384xf32>
    %186 = tpu.matmul %182, %0, %cst_35 {dimension_numbers = #tpu.dot_dimension_numbers<[1], [0], [0], [1], [0, 0, 1, 1], [], []>} : vector<2x128xf32>, vector<128x384xf32>, vector<2x384xf32> -> vector<2x384xf32>
    %187 = vector.extract_strided_slice %185 {offsets = [0, 0], sizes = [2, 128], strides = [1, 1]} : vector<2x384xf32> to vector<2x128xf32>
    %188 = vector.extract_strided_slice %186 {offsets = [0, 0], sizes = [2, 128], strides = [1, 1]} : vector<2x384xf32> to vector<2x128xf32>
    %189 = arith.addf %187, %188 : vector<2x128xf32>
    %190 = arith.negf %189 : vector<2x128xf32>
    %191 = math.exp %190 : vector<2x128xf32>
    %cst_36 = arith.constant 1.000000e+00 : f32
    %192 = vector.broadcast %cst_36 : f32 to vector<2x128xf32>
    %193 = arith.addf %192, %191 : vector<2x128xf32>
    %194 = arith.divf %192, %193 : vector<2x128xf32>
    %195 = vector.extract_strided_slice %185 {offsets = [0, 128], sizes = [2, 128], strides = [1, 1]} : vector<2x384xf32> to vector<2x128xf32>
    %196 = vector.extract_strided_slice %186 {offsets = [0, 128], sizes = [2, 128], strides = [1, 1]} : vector<2x384xf32> to vector<2x128xf32>
    %197 = arith.addf %195, %196 : vector<2x128xf32>
    %198 = arith.negf %197 : vector<2x128xf32>
    %199 = math.exp %198 : vector<2x128xf32>
    %cst_37 = arith.constant 1.000000e+00 : f32
    %200 = vector.broadcast %cst_37 : f32 to vector<2x128xf32>
    %201 = arith.addf %200, %199 : vector<2x128xf32>
    %202 = arith.divf %200, %201 : vector<2x128xf32>
    %203 = vector.extract_strided_slice %185 {offsets = [0, 256], sizes = [2, 128], strides = [1, 1]} : vector<2x384xf32> to vector<2x128xf32>
    %204 = vector.extract_strided_slice %186 {offsets = [0, 256], sizes = [2, 128], strides = [1, 1]} : vector<2x384xf32> to vector<2x128xf32>
    %205 = vector.broadcast %1 : vector<1x128xf32> to vector<2x128xf32>
    %206 = arith.addf %204, %205 : vector<2x128xf32>
    %207 = arith.mulf %194, %206 : vector<2x128xf32>
    %208 = arith.addf %203, %207 : vector<2x128xf32>
    %209 = math.tanh %208 : vector<2x128xf32>
    %210 = arith.subf %182, %209 : vector<2x128xf32>
    %211 = arith.mulf %202, %210 : vector<2x128xf32>
    %212 = arith.addf %209, %211 : vector<2x128xf32>
    %c7_i32 = arith.constant 7 : i32
    %213 = arith.index_cast %c7_i32 : i32 to index
    %c0_38 = arith.constant 0 : index
    %c0_39 = arith.constant 0 : index
    %214 = vector.load %arg1[%213, %c0_38, %c0_39] : memref<8x2x384xf32, #tpu.memory_space<vmem>>, vector<1x2x384xf32>
    %215 = vector.shape_cast %214 : vector<1x2x384xf32> to vector<2x384xf32>
    %cst_40 = arith.constant dense<0.000000e+00> : vector<2x384xf32>
    %216 = tpu.matmul %212, %0, %cst_40 {dimension_numbers = #tpu.dot_dimension_numbers<[1], [0], [0], [1], [0, 0, 1, 1], [], []>} : vector<2x128xf32>, vector<128x384xf32>, vector<2x384xf32> -> vector<2x384xf32>
    %217 = vector.extract_strided_slice %215 {offsets = [0, 0], sizes = [2, 128], strides = [1, 1]} : vector<2x384xf32> to vector<2x128xf32>
    %218 = vector.extract_strided_slice %216 {offsets = [0, 0], sizes = [2, 128], strides = [1, 1]} : vector<2x384xf32> to vector<2x128xf32>
    %219 = arith.addf %217, %218 : vector<2x128xf32>
    %220 = arith.negf %219 : vector<2x128xf32>
    %221 = math.exp %220 : vector<2x128xf32>
    %cst_41 = arith.constant 1.000000e+00 : f32
    %222 = vector.broadcast %cst_41 : f32 to vector<2x128xf32>
    %223 = arith.addf %222, %221 : vector<2x128xf32>
    %224 = arith.divf %222, %223 : vector<2x128xf32>
    %225 = vector.extract_strided_slice %215 {offsets = [0, 128], sizes = [2, 128], strides = [1, 1]} : vector<2x384xf32> to vector<2x128xf32>
    %226 = vector.extract_strided_slice %216 {offsets = [0, 128], sizes = [2, 128], strides = [1, 1]} : vector<2x384xf32> to vector<2x128xf32>
    %227 = arith.addf %225, %226 : vector<2x128xf32>
    %228 = arith.negf %227 : vector<2x128xf32>
    %229 = math.exp %228 : vector<2x128xf32>
    %cst_42 = arith.constant 1.000000e+00 : f32
    %230 = vector.broadcast %cst_42 : f32 to vector<2x128xf32>
    %231 = arith.addf %230, %229 : vector<2x128xf32>
    %232 = arith.divf %230, %231 : vector<2x128xf32>
    %233 = vector.extract_strided_slice %215 {offsets = [0, 256], sizes = [2, 128], strides = [1, 1]} : vector<2x384xf32> to vector<2x128xf32>
    %234 = vector.extract_strided_slice %216 {offsets = [0, 256], sizes = [2, 128], strides = [1, 1]} : vector<2x384xf32> to vector<2x128xf32>
    %235 = vector.broadcast %1 : vector<1x128xf32> to vector<2x128xf32>
    %236 = arith.addf %234, %235 : vector<2x128xf32>
    %237 = arith.mulf %224, %236 : vector<2x128xf32>
    %238 = arith.addf %233, %237 : vector<2x128xf32>
    %239 = math.tanh %238 : vector<2x128xf32>
    %240 = arith.subf %212, %239 : vector<2x128xf32>
    %241 = arith.mulf %232, %240 : vector<2x128xf32>
    %242 = arith.addf %239, %241 : vector<2x128xf32>
    %c8_i32 = arith.constant 8 : i32
    %c0_43 = arith.constant 0 : index
    %c0_44 = arith.constant 0 : index
    %243 = vector.load %arg4[%c0_43, %c0_44] : memref<2x128xf32, #tpu.memory_space<vmem>>, vector<2x128xf32>
    tpu.vector_store %arg4[%c0_43, %c0_44], %242 {strides = array<i32>} : memref<2x128xf32, #tpu.memory_space<vmem>>, vector<2x128xf32>,
    return
  }
  func.func @transform_0(%arg0: i32) -> (i32, i32, i32) {
    %c0_i32 = arith.constant 0 : i32
    %c0_i32_0 = arith.constant 0 : i32
    %c0_i32_1 = arith.constant 0 : i32
    %c0_i32_2 = arith.constant 0 : i32
    return %c0_i32, %c0_i32_0, %c0_i32_1 : i32, i32, i32
  }
  func.func @transform_1(%arg0: i32) -> (i32, i32) {
    %c0_i32 = arith.constant 0 : i32
    %c0_i32_0 = arith.constant 0 : i32
    %c0_i32_1 = arith.constant 0 : i32
    return %c0_i32, %c0_i32_0 : i32, i32
  }
  func.func @transform_2(%arg0: i32) -> (i32, i32) {
    %c0_i32 = arith.constant 0 : i32
    %c0_i32_0 = arith.constant 0 : i32
    %c0_i32_1 = arith.constant 0 : i32
    return %c0_i32, %c0_i32_0 : i32, i32
  }
  func.func @transform_3(%arg0: i32) -> (i32, i32) {
    %c0_i32 = arith.constant 0 : i32
    %c0_i32_0 = arith.constant 0 : i32
    %c0_i32_1 = arith.constant 0 : i32
    return %c0_i32, %c0_i32_0 : i32, i32
  }
}

</mosaic_0001>

<bundles_post_ra>
// kernel: tpu_custom_call.1
= control target key start
LH: loop header
LB: loop body
LE: loop exit
PB: predicated region body
PF: predicated region fallthrough
CT: control target
= control target key end

     0   :  { %8 = vsyncpa [#allocation3], 0  ;;  %s2948_s0 = inlined_call_operand.hbm [shape: f32[8,2,384], index: 0, kind: input, shape index: {}]   ;;  %s2949_s1 = inlined_call_operand.hbm [shape: f32[128,384], index: 1, kind: input, shape index: {}]   ;;  %s2950_s2 = inlined_call_operand.vmem [shape: f32[1,128], index: 2, kind: input, shape index: {}]   ;;  %s2951_s3 = inlined_call_operand.hbm [shape: f32[2,128], index: 3, kind: output, shape index: {}]  }
   0x1   :  { %9 = vsyncpa [#allocation6], 0 }
   0x2   :  { %10 = vsyncpa [#allocation4], 0  ;;  %s2509_s12 = smov [#allocation2]   ;;  %s2437_s16 = scalar_lea.hbm %s2948_s0, 768 }
   0x3   :  { %s16_s13 = sshll.u32 %s2509_s12, 4  ;;  %p2438_p0 = scmp.ne.s32.totalorder %s2948_s0, %s2437_s16  ;;  %s17_s13 = int_to_ptr.vmem [resolvable:$true] %s16_s13 }
   0x4   :  { %p2441_p1 = scmp.lt.u32.totalorder %s2437_s16, %s2948_s0 }
   0x6   :  { %p2443_p2 = pnand %p2441_p1, %p2438_p0 }
   0x8   :  { %2446 = shalt.err (!%p2443_p2)
}
   0x9   :  { %s2447_s21 = scalar_lea.vmem %s17_s13, 768  ;;  %p2452_p4 = scmp.lt.s32.totalorder %s17_s13, %s17_s13 }
   0xa   :  { %p2448_p3 = scmp.ne.s32.totalorder %s17_s13, %s2447_s21  ;;  %p2453_p5 = scmp.lt.s32.totalorder %s2447_s21, %s2447_s21 }
   0xc   :  { %p2454_p6 = por %p2453_p5, %p2452_p4 }
   0xe   :  { %p2455_p7 = pnand %p2454_p6, %p2448_p3 }
  0x10   :  { %2458 = shalt.err (!%p2455_p7)
}
  0x11   :  { %s2510_s22 = smov 96   ;;  %s2511_s23 = smov 6  }
  0x12   :  { %22 = dma.hbm_to_vmem [thread:$0]  %s2948_s0, 768, %s17_s13, [#allocation3], %s2510_s22, %s2510_s22, %s2511_s23  }
  0x13   :  { %s2512_s26 = smov [#allocation5]   ;;  %s2459_s30 = scalar_lea.hbm %s2949_s1, 6144 }
  0x14   :  { %s28_s27 = sshll.u32 %s2512_s26, 4  ;;  %p2460_p8 = scmp.ne.s32.totalorder %s2949_s1, %s2459_s30  ;;  %s29_s27 = int_to_ptr.vmem [resolvable:$true] %s28_s27 }
  0x15   :  { %p2463_p9 = scmp.lt.u32.totalorder %s2459_s30, %s2949_s1 }
  0x17   :  { %p2465_p10 = pnand %p2463_p9, %p2460_p8 }
  0x19   :  { %2468 = shalt.err (!%p2465_p10)
}
  0x1a   :  { %s2469_s8 = scalar_lea.vmem %s29_s27, 6144  ;;  %p2474_p12 = scmp.lt.s32.totalorder %s29_s27, %s29_s27 }
  0x1b   :  { %p2470_p11 = scmp.ne.s32.totalorder %s29_s27, %s2469_s8  ;;  %p2475_p13 = scmp.lt.s32.totalorder %s2469_s8, %s2469_s8 }
  0x1d   :  { %p2476_p0 = por %p2475_p13, %p2474_p12 }
  0x1f   :  { %p2477_p1 = pnand %p2476_p0, %p2470_p11 }
  0x21   :  { %2480 = shalt.err (!%p2477_p1)
}
  0x22   :  { %s2513_s0 = smov 384   ;;  %s2514_s9 = smov 24  }
  0x23   :  { %34 = dma.hbm_to_vmem [thread:$0]  %s2949_s1, 6144, %s29_s27, [#allocation6], %s2513_s0, %s2513_s0, %s2514_s9  }
  0x24   :  { %2503 = dma.done.wait [#allocation3], 768  }
  0x25   :  { %2504 = vsyncadd [#allocation3], 4294966528 }
  0x26   :  { %2505 = dma.done.wait [#allocation6], 6144  }
  0x27   :  { %2506 = vsyncadd [#allocation6], 4294961152  ;;  %v2515_v0 = vmov 0.0|0.0   ;;  %v2516_v1 = vmov 0.0   ;;  %vm2517_vm0 = vmmov 0   ;;  %v44_v2 = vld [vmem:[#allocation5 + $0x8] sm:$0xff] }
  0x28   :  { %1931 = vmatprep.subr.bf16.mxu1 %v2515_v0  ;;  %157 = vmatprep.mubr.f32.mxu0 %v2516_v1  ;;  %v47_v3 = vld [vmem:[#allocation5 + $0x20] sm:$0xff]  ;;  %v46_v6 = vld [vmem:[#allocation5 + $0x18] sm:$0xff]  ;;  %v53_v8 = vld [vmem:[#allocation5 + $0x50] sm:$0xff] }
  0x29   :  { %1651 = vmatprep.mubr.msk.f32.mxu1 %vm2517_vm0, %v2516_v1  ;;  %v43_v4 = vld [vmem:[#allocation5] sm:$0xff]  ;;  %v2567_v5 = vpack.c.bf16 %v47_v3, %v44_v2  ;;  %v50_v7 = vld [vmem:[#allocation5 + $0x38] sm:$0xff]  ;;  %v49_v11 = vld [vmem:[#allocation5 + $0x30] sm:$0xff] }
  0x2a   :  { %v2569_v9 = vpack.c.bf16 %v46_v6, %v43_v4  ;;  %v2571_v10 = vpack.c.bf16 %v53_v8, %v50_v7  ;;  %v52_v12 = vld [vmem:[#allocation5 + $0x48] sm:$0xff]  ;;  %v59_v14 = vld [vmem:[#allocation5 + $0x80] sm:$0xff]  ;;  %v58_v18 = vld [vmem:[#allocation5 + $0x78] sm:$0xff] }
  0x2b   :  { %v56_v13 = vld [vmem:[#allocation5 + $0x68] sm:$0xff]  ;;  %1900 = vmatprep.subr.bf16.mxu0 %v2567_v5  ;;  %v2575_v15 = vpack.c.bf16 %v52_v12, %v49_v11  ;;  %v55_v17 = vld [vmem:[#allocation5 + $0x60] sm:$0xff]  ;;  %v62_v19 = vld [vmem:[#allocation5 + $0x98] sm:$0xff] }
  0x2c   :  { %1902 = vmatpush1.bf16.msra.mxu0 %v2569_v9  ;;  %v2578_v16 = vpack.c.bf16 %v59_v14, %v56_v13  ;;  %v65_v20 = vld [vmem:[#allocation5 + $0xb0] sm:$0xff]  ;;  %v2581_v21 = vpack.c.bf16 %v58_v18, %v55_v17  ;;  %v64_v24 = vld [vmem:[#allocation5 + $0xa8] sm:$0xff]  ;;  %v71_v28 = vld [vmem:[#allocation5 + $0xe0] sm:$0xff] }
  0x2d   :  { %1904 = vmatprep.subr.bf16.mxu0 %v2571_v10  ;;  %v61_v22 = vld [vmem:[#allocation5 + $0x90] sm:$0xff]  ;;  %v2584_v23 = vpack.c.bf16 %v65_v20, %v62_v19  ;;  %v48_v26 = vld [vmem:[#allocation5 + $0x28] sm:$0xff]  ;;  %v51_v30 = vld [vmem:[#allocation5 + $0x40] sm:$0xff] }
  0x2e   :  { %v45_v25 = vld [vmem:[#allocation5 + $0x10] sm:$0xff]  ;;  %v68_v27 = vld [vmem:[#allocation5 + $0xc8] sm:$0xff]  ;;  %v54_v31 = vld [vmem:[#allocation5 + $0x58] sm:$0xff]  ;;  %v2589_v32 = vpack.c.bf16 %v64_v24, %v61_v22 }
  0x2f   :  { %v2586_v29 = vpack.c.bf16 %v48_v26, %v45_v25  ;;  %v67_v33 = vld [vmem:[#allocation5 + $0xc0] sm:$0xff]  ;;  %v2592_v34 = vpack.c.bf16 %v54_v31, %v51_v30  ;;  %v2595_v35 = vpack.c.bf16 %v71_v28, %v68_v27  ;;  %v70_v36 = vld [vmem:[#allocation5 + $0xd8] sm:$0xff]  ;;  %v57_v37 = vld [vmem:[#allocation5 + $0x70] sm:$0xff] }
  0x30   :  { %1906 = vmatpush1.bf16.msra.mxu0 %v2575_v15  ;;  %v60_v38 = vld [vmem:[#allocation5 + $0x88] sm:$0xff]  ;;  %v74_v39 = vld [vmem:[#allocation5 + $0xf8] sm:$0xff]  ;;  %v77_v40 = vld [vmem:[#allocation5 + $0x110] sm:$0xff]  ;;  %v2599_v41 = vpack.c.bf16 %v70_v36, %v67_v33 }
  0x31   :  { %1908 = vmatprep.subr.bf16.mxu0 %v2578_v16  ;;  %1933 = vmatpush3.bf16.msra.mxu1 %v2586_v29  ;;  %v73_v42 = vld [vmem:[#allocation5 + $0xf0] sm:$0xff]  ;;  %v2602_v43 = vpack.c.bf16 %v60_v38, %v57_v37  ;;  %v2605_v44 = vpack.c.bf16 %v77_v40, %v74_v39  ;;  %v76_v45 = vld [vmem:[#allocation5 + $0x108] sm:$0xff]  ;;  %v63_v46 = vld [vmem:[#allocation5 + $0xa0] sm:$0xff] }
  0x32   :  { %1934 = vmatprep.subr.bf16.mxu1 %v2515_v0  ;;  %v66_v47 = vld [vmem:[#allocation5 + $0xb8] sm:$0xff]  ;;  %v80_v48 = vld [vmem:[#allocation5 + $0x128] sm:$0xff]  ;;  %v83_v49 = vld [vmem:[#allocation5 + $0x140] sm:$0xff]  ;;  %v2609_v50 = vpack.c.bf16 %v76_v45, %v73_v42 }
  0x33   :  { %v79_v51 = vld [vmem:[#allocation5 + $0x120] sm:$0xff]  ;;  %v2612_v52 = vpack.c.bf16 %v66_v47, %v63_v46  ;;  %v2615_v53 = vpack.c.bf16 %v83_v49, %v80_v48  ;;  %v82_v54 = vld [vmem:[#allocation5 + $0x138] sm:$0xff]  ;;  %v69_v55 = vld [vmem:[#allocation5 + $0xd0] sm:$0xff] }
  0x34   :  { %1910 = vmatpush1.bf16.msra.mxu0 %v2581_v21  ;;  %v72_v56 = vld [vmem:[#allocation5 + $0xe8] sm:$0xff]  ;;  %v86_v57 = vld [vmem:[#allocation5 + $0x158] sm:$0xff]  ;;  %v89_v58 = vld [vmem:[#allocation5 + $0x170] sm:$0xff]  ;;  %v2619_v59 = vpack.c.bf16 %v82_v54, %v79_v51 }
  0x35   :  { %1912 = vmatprep.subr.bf16.mxu0 %v2584_v23  ;;  %1936 = vmatpush3.bf16.msra.mxu1 %v2592_v34  ;;  %v85_v60 = vld [vmem:[#allocation5 + $0x150] sm:$0xff]  ;;  %v2622_v61 = vpack.c.bf16 %v72_v56, %v69_v55  ;;  %v2625_v62 = vpack.c.bf16 %v89_v58, %v86_v57  ;;  %v88_v63 = vld [vmem:[#allocation5 + $0x168] sm:$0xff]  ;;  %v75_v2 = vld [vmem:[#allocation5 + $0x100] sm:$0xff] }
  0x36   :  { %1937 = vmatprep.subr.bf16.mxu1 %v2515_v0  ;;  %v78_v3 = vld [vmem:[#allocation5 + $0x118] sm:$0xff]  ;;  %v2629_v4 = vpack.c.bf16 %v88_v63, %v85_v60  ;;  %v81_v7 = vld [vmem:[#allocation5 + $0x130] sm:$0xff]  ;;  %v84_v8 = vld [vmem:[#allocation5 + $0x148] sm:$0xff] }
  0x37   :  { %v2632_v6 = vpack.c.bf16 %v78_v3, %v75_v2  ;;  %v2638_v11 = vpack.c.bf16 %v84_v8, %v81_v7  ;;  %v87_v12 = vld [vmem:[#allocation5 + $0x160] sm:$0xff]  ;;  %v90_v13 = vld [vmem:[#allocation5 + $0x178] sm:$0xff]  ;;  %v92_v17 = vld [vmem:[#allocation2] sm:$0x3f] }
  0x38   :  { %1914 = vmatpush1.bf16.msra.mxu0 %v2589_v32  ;;  %v2644_v14 = vpack.c.bf16 %v90_v13, %v87_v12  ;;  %v242_v24 = vrot.slane %v92_v17, 2  ;;  %v2688_v33 = vld [vmem:[%s2950_s2] ss:$0 sm:$0xff]  ;;  %v259_v38 = vrot.slane %v92_v17, 4  ;;  %v267_v54 = vld [vmem:[#allocation2 + $0x6] sm:$0x3f] }
  0x39   :  { %1916 = vmatprep.subr.bf16.mxu0 %v2595_v35  ;;  %1939 = vmatpush3.bf16.msra.mxu1 %v2602_v43  ;;  %v417_v2 = vrot.slane %v267_v54, 2  ;;  %s2518_s2 = smov [#allocation7]  }
  0x3a   :  { %1940 = vmatprep.subr.bf16.mxu1 %v2515_v0  ;;  %s1456_s13 = sshll.u32 %s2518_s2, 4  ;;  %s1457_s13 = int_to_ptr.vmem [resolvable:$true] %s1456_s13 }
  0x3b   :  { %s2481_s14 = scalar_lea.vmem %s1457_s13, 32  ;;  %p2486_p3 = scmp.lt.s32.totalorder %s1457_s13, %s1457_s13 }
  0x3c   :  { %1918 = vmatpush1.bf16.msra.mxu0 %v2599_v41  ;;  %p2482_p2 = scmp.ne.s32.totalorder %s1457_s13, %s2481_s14  ;;  %p2487_p4 = scmp.lt.s32.totalorder %s2481_s14, %s2481_s14 }
  0x3d   :  { %1920 = vmatprep.subr.bf16.mxu0 %v2605_v44  ;;  %1942 = vmatpush3.bf16.msra.mxu1 %v2612_v52 }
  0x3e   :  { %1943 = vmatprep.subr.bf16.mxu1 %v2515_v0  ;;  %p2488_p5 = por %p2487_p4, %p2486_p3 }
  0x40   :  { %1922 = vmatpush1.bf16.msra.mxu0 %v2609_v50  ;;  %p2489_p6 = pnand %p2488_p5, %p2482_p2 }
  0x41   :  { %1924 = vmatprep.subr.bf16.mxu0 %v2615_v53  ;;  %1945 = vmatpush3.bf16.msra.mxu1 %v2622_v61 }
  0x42   :  { %1946 = vmatprep.subr.bf16.mxu1 %v2515_v0 }
  0x44   :  { %1926 = vmatpush1.bf16.msra.mxu0 %v2619_v59 }
  0x45   :  { %1928 = vmatprep.subr.bf16.mxu0 %v2625_v62  ;;  %1948 = vmatpush3.bf16.msra.mxu1 %v2632_v6 }
  0x46   :  { %1949 = vmatprep.subr.bf16.mxu1 %v2515_v0 }
  0x48   :  { %1930 = vmatpush1.bf16.msra.mxu0 %v2629_v4 }
  0x49   :  { %1956 = vmatprep.subr.bf16.mxu0 %v2567_v5  ;;  %1951 = vmatpush3.bf16.msra.mxu1 %v2638_v11 }
  0x4a   :  { %1952 = vmatprep.subr.bf16.mxu1 %v2515_v0 }
  0x4b   :  { %158 = vmatmul.mubr.f32.vlgmr.msra.gmra.mrb[0].mxu0 %v2516_v1 }
  0x4c   :  { %1958 = vmatpush1.bf16.msra.mxu0 %v2569_v9  ;;  %332 = vmatprep.mubr.f32.mxu0 %v2516_v1 }
  0x4d   :  { %1960 = vmatprep.subr.bf16.mxu0 %v2571_v10  ;;  %1954 = vmatpush3.bf16.msra.mxu1 %v2644_v14 }
  0x4e   :  { %1987 = vmatprep.subr.bf16.mxu1 %v2515_v0 }
  0x50   :  { %1962 = vmatpush1.bf16.msra.mxu0 %v2575_v15  ;;  %1652 = vmatmul.mubr.f32.vlgmr.msra.gmra.mrb[0].mxu1 %v2516_v1 }
  0x51   :  { %1964 = vmatprep.subr.bf16.mxu0 %v2578_v16  ;;  %1989 = vmatpush3.bf16.msra.mxu1 %v2586_v29 }
  0x52   :  { %1990 = vmatprep.subr.bf16.mxu1 %v2515_v0  ;;  %1686 = vmatprep.mubr.msk.f32.mxu1 %vm2517_vm0, %v2516_v1 }
  0x54   :  { %1966 = vmatpush1.bf16.msra.mxu0 %v2581_v21 }
  0x55   :  { %1968 = vmatprep.subr.bf16.mxu0 %v2584_v23  ;;  %1992 = vmatpush3.bf16.msra.mxu1 %v2592_v34 }
  0x56   :  { %1993 = vmatprep.subr.bf16.mxu1 %v2515_v0 }
  0x58   :  { %1970 = vmatpush1.bf16.msra.mxu0 %v2589_v32 }
  0x59   :  { %1972 = vmatprep.subr.bf16.mxu0 %v2595_v35  ;;  %1995 = vmatpush3.bf16.msra.mxu1 %v2602_v43 }
  0x5a   :  { %1996 = vmatprep.subr.bf16.mxu1 %v2515_v0 }
  0x5c   :  { %1974 = vmatpush1.bf16.msra.mxu0 %v2599_v41 }
  0x5d   :  { %1976 = vmatprep.subr.bf16.mxu0 %v2605_v44  ;;  %1998 = vmatpush3.bf16.msra.mxu1 %v2612_v52 }
  0x5e   :  { %1999 = vmatprep.subr.bf16.mxu1 %v2515_v0 }
  0x60   :  { %1978 = vmatpush1.bf16.msra.mxu0 %v2609_v50 }
  0x61   :  { %1980 = vmatprep.subr.bf16.mxu0 %v2615_v53  ;;  %2001 = vmatpush3.bf16.msra.mxu1 %v2622_v61 }
  0x62   :  { %2002 = vmatprep.subr.bf16.mxu1 %v2515_v0 }
  0x64   :  { %1982 = vmatpush1.bf16.msra.mxu0 %v2619_v59 }
  0x65   :  { %1984 = vmatprep.subr.bf16.mxu0 %v2625_v62  ;;  %2004 = vmatpush3.bf16.msra.mxu1 %v2632_v6 }
  0x66   :  { %2005 = vmatprep.subr.bf16.mxu1 %v2515_v0 }
  0x68   :  { %1986 = vmatpush1.bf16.msra.mxu0 %v2629_v4 }
  0x69   :  { %2012 = vmatprep.subr.bf16.mxu0 %v2567_v5  ;;  %2007 = vmatpush3.bf16.msra.mxu1 %v2638_v11 }
  0x6a   :  { %2008 = vmatprep.subr.bf16.mxu1 %v2515_v0 }
  0x6d   :  { %2010 = vmatpush3.bf16.msra.mxu1 %v2644_v14 }
  0x6e   :  { %2043 = vmatprep.subr.bf16.mxu1 %v2515_v0 }
 0x11e   :  { %v159_v18 = vpop.f32.mrb[0].mxu0 }
 0x11f   :  { %v234_v19 = vadd.f32 %v159_v18, %v92_v17  ;;  %v161_v20 = vpop.f32.mrb[1].mxu0  ;;  %v428_v17 = vrot.slane %v267_v54, 4 }
 0x120   :  { %v244_v26 = vadd.f32 %v242_v24, %v161_v20 }
 0x121   :  { %v1466_v22 = vmul.f32 -1.442695, %v234_v19 }
 0x122   :  { %v1467_v28 = vmul.f32 -1.442695, %v244_v26 }
 0x123   :  { %2357 = vpow2.f32 %v1466_v22  ;;  %v230_v25 = vpop.f32.mrb[0].mxu1 }
 0x124   :  { %v1653_v27 = vpop.f32.mrb[1].mxu1  ;;  %2359 = vpow2.f32 %v1467_v28  ;;  %v257_v36 = vadd.f32 %v2688_v33, %v230_v25 }
 0x12d   :  { %v2358_v30 = vpop.eup %2357 }
 0x12e   :  { %v238_v31 = vadd.f32 1.0, %v2358_v30  ;;  %v2360_v37 = vpop.eup %2359 }
 0x12f   :  { %v248_v42 = vadd.f32 1.0, %v2360_v37 }
 0x130   :  { %2361 = vrcp.f32 %v238_v31  ;;  %v436_v31 = vld [vmem:[#allocation2 + $0xc] sm:$0x3f] }
 0x13a   :  { %v2362_v39 = vpop.eup %2361 }
 0x13b   :  { %v258_v40 = vmul.f32 %v2362_v39, %v257_v36 }
 0x13d   :  { %v261_v45 = vadd.f32 %v259_v38, %v258_v40 }
 0x13f   :  { %2363 = vtanh.f32 %v261_v45  ;;  %v586_v45 = vrot.slane %v436_v31, 2 }
 0x140   :  { %2365 = vrcp.f32 %v248_v42 }
 0x149   :  { %v2364_v46 = vpop.eup %2363 }
 0x14a   :  { %v263_v47 = vsub.f32 0.0, %v2364_v46  ;;  %v2366_v48 = vpop.eup %2365 }
 0x14c   :  { %v264_v49 = vmul.f32 %v2366_v48, %v263_v47 }
 0x14e   :  { %v2691_v51 = vadd.f32 %v2364_v46, %v264_v49 }
 0x150   :  { %333 = vmatmul.mubr.f32.vlgmr.msra.gmra.mrb[2].mxu0 %v2691_v51  ;;  %1687 = vmatmul.mubr.f32.vlgmr.msra.gmra.mrb[2].mxu1 %v2691_v51 }
 0x151   :  { %2014 = vmatpush1.bf16.msra.mxu0 %v2569_v9  ;;  %2045 = vmatpush3.bf16.msra.mxu1 %v2586_v29 }
 0x152   :  { %2016 = vmatprep.subr.bf16.mxu0 %v2571_v10  ;;  %2046 = vmatprep.subr.bf16.mxu1 %v2515_v0 }
 0x153   :  { %501 = vmatprep.mubr.f32.mxu0 %v2516_v1  ;;  %1721 = vmatprep.mubr.msk.f32.mxu1 %vm2517_vm0, %v2516_v1 }
 0x155   :  { %2018 = vmatpush1.bf16.msra.mxu0 %v2575_v15  ;;  %2048 = vmatpush3.bf16.msra.mxu1 %v2592_v34 }
 0x156   :  { %2020 = vmatprep.subr.bf16.mxu0 %v2578_v16  ;;  %2049 = vmatprep.subr.bf16.mxu1 %v2515_v0 }
 0x159   :  { %2022 = vmatpush1.bf16.msra.mxu0 %v2581_v21  ;;  %2051 = vmatpush3.bf16.msra.mxu1 %v2602_v43 }
 0x15a   :  { %2024 = vmatprep.subr.bf16.mxu0 %v2584_v23  ;;  %2052 = vmatprep.subr.bf16.mxu1 %v2515_v0 }
 0x15d   :  { %2026 = vmatpush1.bf16.msra.mxu0 %v2589_v32  ;;  %2054 = vmatpush3.bf16.msra.mxu1 %v2612_v52 }
 0x15e   :  { %2028 = vmatprep.subr.bf16.mxu0 %v2595_v35  ;;  %2055 = vmatprep.subr.bf16.mxu1 %v2515_v0 }
 0x161   :  { %2030 = vmatpush1.bf16.msra.mxu0 %v2599_v41  ;;  %2057 = vmatpush3.bf16.msra.mxu1 %v2622_v61 }
 0x162   :  { %2032 = vmatprep.subr.bf16.mxu0 %v2605_v44  ;;  %2058 = vmatprep.subr.bf16.mxu1 %v2515_v0 }
 0x165   :  { %2034 = vmatpush1.bf16.msra.mxu0 %v2609_v50  ;;  %2060 = vmatpush3.bf16.msra.mxu1 %v2632_v6 }
 0x166   :  { %2036 = vmatprep.subr.bf16.mxu0 %v2615_v53  ;;  %2061 = vmatprep.subr.bf16.mxu1 %v2515_v0 }
 0x169   :  { %2038 = vmatpush1.bf16.msra.mxu0 %v2619_v59  ;;  %2063 = vmatpush3.bf16.msra.mxu1 %v2638_v11 }
 0x16a   :  { %2040 = vmatprep.subr.bf16.mxu0 %v2625_v62  ;;  %2064 = vmatprep.subr.bf16.mxu1 %v2515_v0 }
 0x16d   :  { %2042 = vmatpush1.bf16.msra.mxu0 %v2629_v4  ;;  %2066 = vmatpush3.bf16.msra.mxu1 %v2644_v14 }
 0x16e   :  { %2068 = vmatprep.subr.bf16.mxu0 %v2567_v5  ;;  %2099 = vmatprep.subr.bf16.mxu1 %v2515_v0 }
 0x223   :  { %v334_v55 = vpop.f32.mrb[2].mxu0  ;;  %v405_v56 = vpop.f32.mrb[2].mxu1 }
 0x224   :  { %v409_v57 = vadd.f32 %v334_v55, %v267_v54  ;;  %v336_v58 = vpop.f32.mrb[3].mxu0  ;;  %v1688_v60 = vpop.f32.mrb[3].mxu1  ;;  %v426_v18 = vadd.f32 %v2688_v33, %v405_v56  ;;  %v597_v54 = vrot.slane %v436_v31, 4 }
 0x225   :  { %v419_v3 = vadd.f32 %v417_v2, %v336_v58 }
 0x226   :  { %v1469_v63 = vmul.f32 -1.442695, %v409_v57 }
 0x227   :  { %v1470_v7 = vmul.f32 -1.442695, %v419_v3 }
 0x228   :  { %2367 = vpow2.f32 %v1469_v63 }
 0x229   :  { %2369 = vpow2.f32 %v1470_v7 }
 0x232   :  { %v2368_v8 = vpop.eup %2367 }
 0x233   :  { %v413_v12 = vadd.f32 1.0, %v2368_v8  ;;  %v2370_v13 = vpop.eup %2369 }
 0x234   :  { %v423_v24 = vadd.f32 1.0, %v2370_v13 }
 0x235   :  { %2371 = vrcp.f32 %v413_v12  ;;  %v605_v12 = vld [vmem:[#allocation2 + $0x12] sm:$0x3f] }
 0x23f   :  { %v2372_v19 = vpop.eup %2371 }
 0x240   :  { %v427_v20 = vmul.f32 %v2372_v19, %v426_v18 }
 0x242   :  { %v430_v22 = vadd.f32 %v428_v17, %v427_v20 }
 0x244   :  { %2373 = vtanh.f32 %v430_v22 }
 0x245   :  { %2375 = vrcp.f32 %v423_v24  ;;  %v755_v24 = vrot.slane %v605_v12, 2 }
 0x24e   :  { %v2374_v25 = vpop.eup %2373 }
 0x24f   :  { %v432_v26 = vsub.f32 %v2691_v51, %v2374_v25  ;;  %v2376_v27 = vpop.eup %2375 }
 0x251   :  { %v433_v28 = vmul.f32 %v2376_v27, %v432_v26 }
 0x253   :  { %v2732_v30 = vadd.f32 %v2374_v25, %v433_v28 }
 0x255   :  { %502 = vmatmul.mubr.f32.vlgmr.msra.gmra.mrb[4].mxu0 %v2732_v30  ;;  %1722 = vmatmul.mubr.f32.vlgmr.msra.gmra.mrb[4].mxu1 %v2732_v30 }
 0x256   :  { %2070 = vmatpush1.bf16.msra.mxu0 %v2569_v9  ;;  %2101 = vmatpush3.bf16.msra.mxu1 %v2586_v29 }
 0x257   :  { %2072 = vmatprep.subr.bf16.mxu0 %v2571_v10  ;;  %2102 = vmatprep.subr.bf16.mxu1 %v2515_v0 }
 0x258   :  { %670 = vmatprep.mubr.f32.mxu0 %v2516_v1  ;;  %1756 = vmatprep.mubr.msk.f32.mxu1 %vm2517_vm0, %v2516_v1 }
 0x25a   :  { %2074 = vmatpush1.bf16.msra.mxu0 %v2575_v15  ;;  %2104 = vmatpush3.bf16.msra.mxu1 %v2592_v34 }
 0x25b   :  { %2076 = vmatprep.subr.bf16.mxu0 %v2578_v16  ;;  %2105 = vmatprep.subr.bf16.mxu1 %v2515_v0 }
 0x25e   :  { %2078 = vmatpush1.bf16.msra.mxu0 %v2581_v21  ;;  %2107 = vmatpush3.bf16.msra.mxu1 %v2602_v43 }
 0x25f   :  { %2080 = vmatprep.subr.bf16.mxu0 %v2584_v23  ;;  %2108 = vmatprep.subr.bf16.mxu1 %v2515_v0 }
 0x262   :  { %2082 = vmatpush1.bf16.msra.mxu0 %v2589_v32  ;;  %2110 = vmatpush3.bf16.msra.mxu1 %v2612_v52 }
 0x263   :  { %2084 = vmatprep.subr.bf16.mxu0 %v2595_v35  ;;  %2111 = vmatprep.subr.bf16.mxu1 %v2515_v0 }
 0x266   :  { %2086 = vmatpush1.bf16.msra.mxu0 %v2599_v41  ;;  %2113 = vmatpush3.bf16.msra.mxu1 %v2622_v61 }
 0x267   :  { %2088 = vmatprep.subr.bf16.mxu0 %v2605_v44  ;;  %2114 = vmatprep.subr.bf16.mxu1 %v2515_v0 }
 0x26a   :  { %2090 = vmatpush1.bf16.msra.mxu0 %v2609_v50  ;;  %2116 = vmatpush3.bf16.msra.mxu1 %v2632_v6 }
 0x26b   :  { %2092 = vmatprep.subr.bf16.mxu0 %v2615_v53  ;;  %2117 = vmatprep.subr.bf16.mxu1 %v2515_v0 }
 0x26e   :  { %2094 = vmatpush1.bf16.msra.mxu0 %v2619_v59  ;;  %2119 = vmatpush3.bf16.msra.mxu1 %v2638_v11 }
 0x26f   :  { %2096 = vmatprep.subr.bf16.mxu0 %v2625_v62  ;;  %2120 = vmatprep.subr.bf16.mxu1 %v2515_v0 }
 0x272   :  { %2098 = vmatpush1.bf16.msra.mxu0 %v2629_v4  ;;  %2122 = vmatpush3.bf16.msra.mxu1 %v2644_v14 }
 0x273   :  { %2124 = vmatprep.subr.bf16.mxu0 %v2567_v5  ;;  %2155 = vmatprep.subr.bf16.mxu1 %v2515_v0 }
 0x328   :  { %v503_v36 = vpop.f32.mrb[4].mxu0  ;;  %v574_v37 = vpop.f32.mrb[4].mxu1 }
 0x329   :  { %v578_v38 = vadd.f32 %v503_v36, %v436_v31  ;;  %v505_v39 = vpop.f32.mrb[5].mxu0  ;;  %v1723_v40 = vpop.f32.mrb[5].mxu1  ;;  %v595_v55 = vadd.f32 %v2688_v33, %v574_v37  ;;  %v766_v31 = vrot.slane %v605_v12, 4 }
 0x32a   :  { %v588_v46 = vadd.f32 %v586_v45, %v505_v39 }
 0x32b   :  { %v1471_v42 = vmul.f32 -1.442695, %v578_v38 }
 0x32c   :  { %v1472_v47 = vmul.f32 -1.442695, %v588_v46 }
 0x32d   :  { %2377 = vpow2.f32 %v1471_v42 }
 0x32e   :  { %2379 = vpow2.f32 %v1472_v47 }
 0x337   :  { %v2378_v48 = vpop.eup %2377 }
 0x338   :  { %v582_v49 = vadd.f32 1.0, %v2378_v48  ;;  %v2380_v51 = vpop.eup %2379 }
 0x339   :  { %v592_v60 = vadd.f32 1.0, %v2380_v51 }
 0x33a   :  { %2381 = vrcp.f32 %v582_v49  ;;  %v774_v49 = vld [vmem:[#allocation2 + $0x18] sm:$0x3f] }
 0x344   :  { %v2382_v56 = vpop.eup %2381 }
 0x345   :  { %v596_v57 = vmul.f32 %v2382_v56, %v595_v55 }
 0x347   :  { %v599_v58 = vadd.f32 %v597_v54, %v596_v57 }
 0x349   :  { %2383 = vtanh.f32 %v599_v58 }
 0x34a   :  { %2385 = vrcp.f32 %v592_v60  ;;  %v924_v60 = vrot.slane %v774_v49, 2 }
 0x353   :  { %v2384_v63 = vpop.eup %2383 }
 0x354   :  { %v601_v2 = vsub.f32 %v2732_v30, %v2384_v63  ;;  %v2386_v3 = vpop.eup %2385 }
 0x356   :  { %v602_v7 = vmul.f32 %v2386_v3, %v601_v2 }
 0x358   :  { %v2773_v8 = vadd.f32 %v2384_v63, %v602_v7 }
 0x35a   :  { %671 = vmatmul.mubr.f32.vlgmr.msra.gmra.mrb[6].mxu0 %v2773_v8  ;;  %1757 = vmatmul.mubr.f32.vlgmr.msra.gmra.mrb[6].mxu1 %v2773_v8 }
 0x35b   :  { %2126 = vmatpush1.bf16.msra.mxu0 %v2569_v9  ;;  %2157 = vmatpush3.bf16.msra.mxu1 %v2586_v29 }
 0x35c   :  { %2128 = vmatprep.subr.bf16.mxu0 %v2571_v10  ;;  %2158 = vmatprep.subr.bf16.mxu1 %v2515_v0 }
 0x35d   :  { %839 = vmatprep.mubr.f32.mxu0 %v2516_v1  ;;  %1791 = vmatprep.mubr.msk.f32.mxu1 %vm2517_vm0, %v2516_v1 }
 0x35f   :  { %2130 = vmatpush1.bf16.msra.mxu0 %v2575_v15  ;;  %2160 = vmatpush3.bf16.msra.mxu1 %v2592_v34 }
 0x360   :  { %2132 = vmatprep.subr.bf16.mxu0 %v2578_v16  ;;  %2161 = vmatprep.subr.bf16.mxu1 %v2515_v0 }
 0x363   :  { %2134 = vmatpush1.bf16.msra.mxu0 %v2581_v21  ;;  %2163 = vmatpush3.bf16.msra.mxu1 %v2602_v43 }
 0x364   :  { %2136 = vmatprep.subr.bf16.mxu0 %v2584_v23  ;;  %2164 = vmatprep.subr.bf16.mxu1 %v2515_v0 }
 0x367   :  { %2138 = vmatpush1.bf16.msra.mxu0 %v2589_v32  ;;  %2166 = vmatpush3.bf16.msra.mxu1 %v2612_v52 }
 0x368   :  { %2140 = vmatprep.subr.bf16.mxu0 %v2595_v35  ;;  %2167 = vmatprep.subr.bf16.mxu1 %v2515_v0 }
 0x36b   :  { %2142 = vmatpush1.bf16.msra.mxu0 %v2599_v41  ;;  %2169 = vmatpush3.bf16.msra.mxu1 %v2622_v61 }
 0x36c   :  { %2144 = vmatprep.subr.bf16.mxu0 %v2605_v44  ;;  %2170 = vmatprep.subr.bf16.mxu1 %v2515_v0 }
 0x36f   :  { %2146 = vmatpush1.bf16.msra.mxu0 %v2609_v50  ;;  %2172 = vmatpush3.bf16.msra.mxu1 %v2632_v6 }
 0x370   :  { %2148 = vmatprep.subr.bf16.mxu0 %v2615_v53  ;;  %2173 = vmatprep.subr.bf16.mxu1 %v2515_v0 }
 0x373   :  { %2150 = vmatpush1.bf16.msra.mxu0 %v2619_v59  ;;  %2175 = vmatpush3.bf16.msra.mxu1 %v2638_v11 }
 0x374   :  { %2152 = vmatprep.subr.bf16.mxu0 %v2625_v62  ;;  %2176 = vmatprep.subr.bf16.mxu1 %v2515_v0 }
 0x377   :  { %2154 = vmatpush1.bf16.msra.mxu0 %v2629_v4  ;;  %2178 = vmatpush3.bf16.msra.mxu1 %v2644_v14 }
 0x378   :  { %2180 = vmatprep.subr.bf16.mxu0 %v2567_v5  ;;  %2211 = vmatprep.subr.bf16.mxu1 %v2515_v0 }
 0x42d   :  { %v672_v13 = vpop.f32.mrb[6].mxu0  ;;  %v743_v17 = vpop.f32.mrb[6].mxu1 }
 0x42e   :  { %v747_v18 = vadd.f32 %v672_v13, %v605_v12  ;;  %v674_v19 = vpop.f32.mrb[7].mxu0  ;;  %v1758_v20 = vpop.f32.mrb[7].mxu1  ;;  %v764_v36 = vadd.f32 %v2688_v33, %v743_v17  ;;  %v935_v12 = vrot.slane %v774_v49, 4 }
 0x42f   :  { %v757_v25 = vadd.f32 %v755_v24, %v674_v19 }
 0x430   :  { %v1473_v22 = vmul.f32 -1.442695, %v747_v18 }
 0x431   :  { %v1474_v26 = vmul.f32 -1.442695, %v757_v25 }
 0x432   :  { %2387 = vpow2.f32 %v1473_v22 }
 0x433   :  { %2389 = vpow2.f32 %v1474_v26 }
 0x43c   :  { %v2388_v27 = vpop.eup %2387 }
 0x43d   :  { %v751_v28 = vadd.f32 1.0, %v2388_v27  ;;  %v2390_v30 = vpop.eup %2389 }
 0x43e   :  { %v761_v40 = vadd.f32 1.0, %v2390_v30 }
 0x43f   :  { %2391 = vrcp.f32 %v751_v28  ;;  %v943_v28 = vld [vmem:[#allocation2 + $0x1e] sm:$0x3f] }
 0x449   :  { %v2392_v37 = vpop.eup %2391 }
 0x44a   :  { %v765_v38 = vmul.f32 %v2392_v37, %v764_v36 }
 0x44c   :  { %v768_v39 = vadd.f32 %v766_v31, %v765_v38 }
 0x44e   :  { %2393 = vtanh.f32 %v768_v39 }
 0x44f   :  { %2395 = vrcp.f32 %v761_v40  ;;  %v1093_v40 = vrot.slane %v943_v28, 2 }
 0x458   :  { %v2394_v42 = vpop.eup %2393 }
 0x459   :  { %v770_v45 = vsub.f32 %v2773_v8, %v2394_v42  ;;  %v2396_v46 = vpop.eup %2395 }
 0x45b   :  { %v771_v47 = vmul.f32 %v2396_v46, %v770_v45 }
 0x45d   :  { %v2814_v48 = vadd.f32 %v2394_v42, %v771_v47 }
 0x45f   :  { %840 = vmatmul.mubr.f32.vlgmr.msra.gmra.mrb[8].mxu0 %v2814_v48  ;;  %1792 = vmatmul.mubr.f32.vlgmr.msra.gmra.mrb[8].mxu1 %v2814_v48 }
 0x460   :  { %2182 = vmatpush1.bf16.msra.mxu0 %v2569_v9  ;;  %2213 = vmatpush3.bf16.msra.mxu1 %v2586_v29 }
 0x461   :  { %2184 = vmatprep.subr.bf16.mxu0 %v2571_v10  ;;  %2214 = vmatprep.subr.bf16.mxu1 %v2515_v0 }
 0x462   :  { %1008 = vmatprep.mubr.f32.mxu0 %v2516_v1  ;;  %1826 = vmatprep.mubr.msk.f32.mxu1 %vm2517_vm0, %v2516_v1 }
 0x464   :  { %2186 = vmatpush1.bf16.msra.mxu0 %v2575_v15  ;;  %2216 = vmatpush3.bf16.msra.mxu1 %v2592_v34 }
 0x465   :  { %2188 = vmatprep.subr.bf16.mxu0 %v2578_v16  ;;  %2217 = vmatprep.subr.bf16.mxu1 %v2515_v0 }
 0x468   :  { %2190 = vmatpush1.bf16.msra.mxu0 %v2581_v21  ;;  %2219 = vmatpush3.bf16.msra.mxu1 %v2602_v43 }
 0x469   :  { %2192 = vmatprep.subr.bf16.mxu0 %v2584_v23  ;;  %2220 = vmatprep.subr.bf16.mxu1 %v2515_v0 }
 0x46c   :  { %2194 = vmatpush1.bf16.msra.mxu0 %v2589_v32  ;;  %2222 = vmatpush3.bf16.msra.mxu1 %v2612_v52 }
 0x46d   :  { %2196 = vmatprep.subr.bf16.mxu0 %v2595_v35  ;;  %2223 = vmatprep.subr.bf16.mxu1 %v2515_v0 }
 0x470   :  { %2198 = vmatpush1.bf16.msra.mxu0 %v2599_v41  ;;  %2225 = vmatpush3.bf16.msra.mxu1 %v2622_v61 }
 0x471   :  { %2200 = vmatprep.subr.bf16.mxu0 %v2605_v44  ;;  %2226 = vmatprep.subr.bf16.mxu1 %v2515_v0 }
 0x474   :  { %2202 = vmatpush1.bf16.msra.mxu0 %v2609_v50  ;;  %2228 = vmatpush3.bf16.msra.mxu1 %v2632_v6 }
 0x475   :  { %2204 = vmatprep.subr.bf16.mxu0 %v2615_v53  ;;  %2229 = vmatprep.subr.bf16.mxu1 %v2515_v0 }
 0x478   :  { %2206 = vmatpush1.bf16.msra.mxu0 %v2619_v59  ;;  %2231 = vmatpush3.bf16.msra.mxu1 %v2638_v11 }
 0x479   :  { %2208 = vmatprep.subr.bf16.mxu0 %v2625_v62  ;;  %2232 = vmatprep.subr.bf16.mxu1 %v2515_v0 }
 0x47c   :  { %2210 = vmatpush1.bf16.msra.mxu0 %v2629_v4  ;;  %2234 = vmatpush3.bf16.msra.mxu1 %v2644_v14 }
 0x47d   :  { %2236 = vmatprep.subr.bf16.mxu0 %v2567_v5  ;;  %2267 = vmatprep.subr.bf16.mxu1 %v2515_v0 }
 0x532   :  { %v841_v51 = vpop.f32.mrb[8].mxu0  ;;  %v912_v54 = vpop.f32.mrb[8].mxu1 }
 0x533   :  { %v916_v55 = vadd.f32 %v841_v51, %v774_v49  ;;  %v843_v56 = vpop.f32.mrb[9].mxu0  ;;  %v1793_v57 = vpop.f32.mrb[9].mxu1  ;;  %v933_v13 = vadd.f32 %v2688_v33, %v912_v54  ;;  %v1104_v49 = vrot.slane %v943_v28, 4 }
 0x534   :  { %v926_v63 = vadd.f32 %v924_v60, %v843_v56 }
 0x535   :  { %v1475_v58 = vmul.f32 -1.442695, %v916_v55 }
 0x536   :  { %v1476_v2 = vmul.f32 -1.442695, %v926_v63 }
 0x537   :  { %2397 = vpow2.f32 %v1475_v58 }
 0x538   :  { %2399 = vpow2.f32 %v1476_v2 }
 0x541   :  { %v2398_v3 = vpop.eup %2397 }
 0x542   :  { %v920_v7 = vadd.f32 1.0, %v2398_v3  ;;  %v2400_v8 = vpop.eup %2399 }
 0x543   :  { %v930_v20 = vadd.f32 1.0, %v2400_v8 }
 0x544   :  { %2401 = vrcp.f32 %v920_v7 }
 0x54e   :  { %v2402_v17 = vpop.eup %2401 }
 0x54f   :  { %v934_v18 = vmul.f32 %v2402_v17, %v933_v13 }
 0x551   :  { %v937_v19 = vadd.f32 %v935_v12, %v934_v18 }
 0x553   :  { %2403 = vtanh.f32 %v937_v19 }
 0x554   :  { %2405 = vrcp.f32 %v930_v20 }
 0x55d   :  { %v2404_v22 = vpop.eup %2403 }
 0x55e   :  { %v939_v24 = vsub.f32 %v2814_v48, %v2404_v22  ;;  %v2406_v25 = vpop.eup %2405 }
 0x560   :  { %v940_v26 = vmul.f32 %v2406_v25, %v939_v24 }
 0x562   :  { %v2855_v27 = vadd.f32 %v2404_v22, %v940_v26 }
 0x564   :  { %1009 = vmatmul.mubr.f32.vlgmr.msra.gmra.mrb[10].mxu0 %v2855_v27  ;;  %1827 = vmatmul.mubr.f32.vlgmr.msra.gmra.mrb[10].mxu1 %v2855_v27 }
 0x565   :  { %2238 = vmatpush1.bf16.msra.mxu0 %v2569_v9  ;;  %2269 = vmatpush3.bf16.msra.mxu1 %v2586_v29 }
 0x566   :  { %2240 = vmatprep.subr.bf16.mxu0 %v2571_v10  ;;  %2270 = vmatprep.subr.bf16.mxu1 %v2515_v0 }
 0x567   :  { %1177 = vmatprep.mubr.f32.mxu0 %v2516_v1  ;;  %1861 = vmatprep.mubr.msk.f32.mxu1 %vm2517_vm0, %v2516_v1 }
 0x569   :  { %2242 = vmatpush1.bf16.msra.mxu0 %v2575_v15  ;;  %2272 = vmatpush3.bf16.msra.mxu1 %v2592_v34 }
 0x56a   :  { %2244 = vmatprep.subr.bf16.mxu0 %v2578_v16  ;;  %2273 = vmatprep.subr.bf16.mxu1 %v2515_v0 }
 0x56d   :  { %2246 = vmatpush1.bf16.msra.mxu0 %v2581_v21  ;;  %2275 = vmatpush3.bf16.msra.mxu1 %v2602_v43 }
 0x56e   :  { %2248 = vmatprep.subr.bf16.mxu0 %v2584_v23  ;;  %2276 = vmatprep.subr.bf16.mxu1 %v2515_v0 }
 0x571   :  { %2250 = vmatpush1.bf16.msra.mxu0 %v2589_v32  ;;  %2278 = vmatpush3.bf16.msra.mxu1 %v2612_v52 }
 0x572   :  { %2252 = vmatprep.subr.bf16.mxu0 %v2595_v35  ;;  %2279 = vmatprep.subr.bf16.mxu1 %v2515_v0 }
 0x575   :  { %2254 = vmatpush1.bf16.msra.mxu0 %v2599_v41  ;;  %2281 = vmatpush3.bf16.msra.mxu1 %v2622_v61 }
 0x576   :  { %2256 = vmatprep.subr.bf16.mxu0 %v2605_v44  ;;  %2282 = vmatprep.subr.bf16.mxu1 %v2515_v0 }
 0x579   :  { %2258 = vmatpush1.bf16.msra.mxu0 %v2609_v50  ;;  %2284 = vmatpush3.bf16.msra.mxu1 %v2632_v6 }
 0x57a   :  { %2260 = vmatprep.subr.bf16.mxu0 %v2615_v53  ;;  %2285 = vmatprep.subr.bf16.mxu1 %v2515_v0 }
 0x57d   :  { %2262 = vmatpush1.bf16.msra.mxu0 %v2619_v59  ;;  %2287 = vmatpush3.bf16.msra.mxu1 %v2638_v11 }
 0x57e   :  { %2264 = vmatprep.subr.bf16.mxu0 %v2625_v62  ;;  %2288 = vmatprep.subr.bf16.mxu1 %v2515_v0 }
 0x581   :  { %2266 = vmatpush1.bf16.msra.mxu0 %v2629_v4  ;;  %2290 = vmatpush3.bf16.msra.mxu1 %v2644_v14 }
 0x582   :  { %2292 = vmatprep.subr.bf16.mxu0 %v2567_v5  ;;  %2323 = vmatprep.subr.bf16.mxu1 %v2515_v0 }
 0x637   :  { %v1010_v30 = vpop.f32.mrb[10].mxu0  ;;  %v1081_v31 = vpop.f32.mrb[10].mxu1 }
 0x638   :  { %v1085_v36 = vadd.f32 %v1010_v30, %v943_v28  ;;  %v1012_v37 = vpop.f32.mrb[11].mxu0  ;;  %v1828_v38 = vpop.f32.mrb[11].mxu1  ;;  %v1102_v5 = vadd.f32 %v2688_v33, %v1081_v31 }
 0x639   :  { %v1095_v42 = vadd.f32 %v1093_v40, %v1012_v37 }
 0x63a   :  { %v1477_v39 = vmul.f32 -1.442695, %v1085_v36 }
 0x63b   :  { %v1478_v45 = vmul.f32 -1.442695, %v1095_v42 }
 0x63c   :  { %2407 = vpow2.f32 %v1477_v39 }
 0x63d   :  { %2409 = vpow2.f32 %v1478_v45 }
 0x646   :  { %v2408_v46 = vpop.eup %2407 }
 0x647   :  { %v1089_v47 = vadd.f32 1.0, %v2408_v46  ;;  %v2410_v48 = vpop.eup %2409 }
 0x648   :  { %v1099_v56 = vadd.f32 1.0, %v2410_v48 }
 0x649   :  { %2411 = vrcp.f32 %v1089_v47 }
 0x653   :  { %v2412_v51 = vpop.eup %2411 }
 0x654   :  { %v1103_v54 = vmul.f32 %v2412_v51, %v1102_v5 }
 0x656   :  { %v1106_v55 = vadd.f32 %v1104_v49, %v1103_v54 }
 0x658   :  { %2413 = vtanh.f32 %v1106_v55 }
 0x659   :  { %2415 = vrcp.f32 %v1099_v56 }
 0x662   :  { %v2414_v57 = vpop.eup %2413 }
 0x663   :  { %v1108_v58 = vsub.f32 %v2855_v27, %v2414_v57  ;;  %v2416_v60 = vpop.eup %2415 }
 0x665   :  { %v1109_v63 = vmul.f32 %v2416_v60, %v1108_v58 }
 0x667   :  { %v2896_v2 = vadd.f32 %v2414_v57, %v1109_v63 }
 0x669   :  { %1178 = vmatmul.mubr.f32.vlgmr.msra.gmra.mrb[12].mxu0 %v2896_v2  ;;  %1862 = vmatmul.mubr.f32.vlgmr.msra.gmra.mrb[12].mxu1 %v2896_v2 }
 0x66a   :  { %2294 = vmatpush1.bf16.msra.mxu0 %v2569_v9  ;;  %2325 = vmatpush3.bf16.msra.mxu1 %v2586_v29 }
 0x66b   :  { %2296 = vmatprep.subr.bf16.mxu0 %v2571_v10  ;;  %2326 = vmatprep.subr.bf16.mxu1 %v2515_v0 }
 0x66c   :  { %1346 = vmatprep.mubr.f32.mxu0 %v2516_v1  ;;  %1896 = vmatprep.mubr.msk.f32.mxu1 %vm2517_vm0, %v2516_v1  ;;  %v1112_v1 = vld [vmem:[#allocation2 + $0x24] sm:$0x3f] }
 0x66d   :  { %v1262_v29 = vrot.slane %v1112_v1, 2 }
 0x66e   :  { %2298 = vmatpush1.bf16.msra.mxu0 %v2575_v15  ;;  %2328 = vmatpush3.bf16.msra.mxu1 %v2592_v34 }
 0x66f   :  { %2300 = vmatprep.subr.bf16.mxu0 %v2578_v16  ;;  %2329 = vmatprep.subr.bf16.mxu1 %v2515_v0 }
 0x672   :  { %2302 = vmatpush1.bf16.msra.mxu0 %v2581_v21  ;;  %2331 = vmatpush3.bf16.msra.mxu1 %v2602_v43  ;;  %v1273_v43 = vrot.slane %v1112_v1, 4 }
 0x673   :  { %2304 = vmatprep.subr.bf16.mxu0 %v2584_v23  ;;  %2332 = vmatprep.subr.bf16.mxu1 %v2515_v0 }
 0x676   :  { %2306 = vmatpush1.bf16.msra.mxu0 %v2589_v32  ;;  %2334 = vmatpush3.bf16.msra.mxu1 %v2612_v52 }
 0x677   :  { %2308 = vmatprep.subr.bf16.mxu0 %v2595_v35  ;;  %2335 = vmatprep.subr.bf16.mxu1 %v2515_v0 }
 0x67a   :  { %2310 = vmatpush1.bf16.msra.mxu0 %v2599_v41  ;;  %2337 = vmatpush3.bf16.msra.mxu1 %v2622_v61 }
 0x67b   :  { %2312 = vmatprep.subr.bf16.mxu0 %v2605_v44  ;;  %2338 = vmatprep.subr.bf16.mxu1 %v2515_v0 }
 0x67e   :  { %2314 = vmatpush1.bf16.msra.mxu0 %v2609_v50  ;;  %2340 = vmatpush3.bf16.msra.mxu1 %v2632_v6 }
 0x67f   :  { %2316 = vmatprep.subr.bf16.mxu0 %v2615_v53  ;;  %2341 = vmatprep.subr.bf16.mxu1 %v2515_v0 }
 0x682   :  { %2318 = vmatpush1.bf16.msra.mxu0 %v2619_v59  ;;  %2343 = vmatpush3.bf16.msra.mxu1 %v2638_v11 }
 0x683   :  { %2320 = vmatprep.subr.bf16.mxu0 %v2625_v62  ;;  %2344 = vmatprep.subr.bf16.mxu1 %v2515_v0 }
 0x686   :  { %2322 = vmatpush1.bf16.msra.mxu0 %v2629_v4  ;;  %2346 = vmatpush3.bf16.msra.mxu1 %v2644_v14  ;;  %v1281_v14 = vld [vmem:[#allocation2 + $0x2a] sm:$0x3f] }
 0x687   :  { %v1431_v18 = vrot.slane %v1281_v14, 2  ;;  %v1442_v26 = vrot.slane %v1281_v14, 4 }
 0x73c   :  { %v1179_v9 = vpop.f32.mrb[12].mxu0  ;;  %v1250_v10 = vpop.f32.mrb[12].mxu1 }
 0x73d   :  { %v1254_v15 = vadd.f32 %v1179_v9, %v1112_v1  ;;  %v1181_v16 = vpop.f32.mrb[13].mxu0  ;;  %v1863_v21 = vpop.f32.mrb[13].mxu1  ;;  %v1271_v44 = vadd.f32 %v2688_v33, %v1250_v10 }
 0x73e   :  { %v1264_v32 = vadd.f32 %v1262_v29, %v1181_v16 }
 0x73f   :  { %v1479_v23 = vmul.f32 -1.442695, %v1254_v15 }
 0x740   :  { %v1480_v34 = vmul.f32 -1.442695, %v1264_v32 }
 0x741   :  { %2417 = vpow2.f32 %v1479_v23 }
 0x742   :  { %2419 = vpow2.f32 %v1480_v34 }
 0x74b   :  { %v2418_v35 = vpop.eup %2417 }
 0x74c   :  { %v1258_v41 = vadd.f32 1.0, %v2418_v35  ;;  %v2420_v0 = vpop.eup %2419 }
 0x74d   :  { %v1268_v59 = vadd.f32 1.0, %v2420_v0 }
 0x74e   :  { %2421 = vrcp.f32 %v1258_v41 }
 0x758   :  { %v2422_v50 = vpop.eup %2421 }
 0x759   :  { %v1272_v52 = vmul.f32 %v2422_v50, %v1271_v44 }
 0x75b   :  { %v1275_v53 = vadd.f32 %v1273_v43, %v1272_v52 }
 0x75d   :  { %2423 = vtanh.f32 %v1275_v53 }
 0x75e   :  { %2425 = vrcp.f32 %v1268_v59 }
 0x767   :  { %v2424_v61 = vpop.eup %2423 }
 0x768   :  { %v1277_v62 = vsub.f32 %v2896_v2, %v2424_v61  ;;  %v2426_v4 = vpop.eup %2425 }
 0x76a   :  { %v1278_v6 = vmul.f32 %v2426_v4, %v1277_v62 }
 0x76c   :  { %v1279_v11 = vadd.f32 %v2424_v61, %v1278_v6 }
 0x76e   :  { %1347 = vmatmul.mubr.f32.vlgmr.msra.gmra.mrb[14].mxu0 %v1279_v11  ;;  %1897 = vmatmul.mubr.f32.vlgmr.msra.gmra.mrb[14].mxu1 %v1279_v11 }
 0x841   :  { %v1348_v3 = vpop.f32.mrb[14].mxu0  ;;  %v1419_v7 = vpop.f32.mrb[14].mxu1 }
 0x842   :  { %v1423_v8 = vadd.f32 %v1348_v3, %v1281_v14  ;;  %v1350_v12 = vpop.f32.mrb[15].mxu0  ;;  %v1898_v13 = vpop.f32.mrb[15].mxu1  ;;  %v1440_v27 = vadd.f32 %v2688_v33, %v1419_v7 }
 0x843   :  { %v1433_v19 = vadd.f32 %v1431_v18, %v1350_v12 }
 0x844   :  { %v1481_v17 = vmul.f32 -1.442695, %v1423_v8 }
 0x845   :  { %v1482_v20 = vmul.f32 -1.442695, %v1433_v19 }
 0x846   :  { %2427 = vpow2.f32 %v1481_v17 }
 0x847   :  { %2429 = vpow2.f32 %v1482_v20 }
 0x850   :  { %v2428_v22 = vpop.eup %2427 }
 0x851   :  { %v1427_v24 = vadd.f32 1.0, %v2428_v22  ;;  %v2430_v25 = vpop.eup %2429 }
 0x852   :  { %v1437_v36 = vadd.f32 1.0, %v2430_v25 }
 0x853   :  { %2431 = vrcp.f32 %v1427_v24 }
 0x85d   :  { %v2432_v28 = vpop.eup %2431 }
 0x85e   :  { %v1441_v30 = vmul.f32 %v2432_v28, %v1440_v27 }
 0x860   :  { %v1444_v31 = vadd.f32 %v1442_v26, %v1441_v30 }
 0x862   :  { %2433 = vtanh.f32 %v1444_v31 }
 0x863   :  { %2435 = vrcp.f32 %v1437_v36 }
 0x86c   :  { %v2434_v37 = vpop.eup %2433 }
 0x86d   :  { %v1446_v38 = vsub.f32 %v1279_v11, %v2434_v37  ;;  %v2436_v39 = vpop.eup %2435 }
 0x86f   :  { %v1447_v40 = vmul.f32 %v2436_v39, %v1446_v38 }
 0x871   :  { %v1448_v42 = vadd.f32 %v2434_v37, %v1447_v40 }
 0x873   :  { %1449 = vst [vmem:[#allocation7] sm:$0x3] %v1448_v42 }
 0x874   :  { %2492 = shalt.err (!%p2489_p6)
}
 0x875   :  { %s2493_s17 = scalar_lea.hbm %s2951_s3, 32 }
 0x876   :  { %p2494_p7 = scmp.ne.s32.totalorder %s2951_s3, %s2493_s17  ;;  %p2497_p8 = scmp.lt.u32.totalorder %s2493_s17, %s2951_s3 }
 0x878   :  { %p2499_p9 = pnand %p2497_p8, %p2494_p7 }
 0x87a   :  { %2502 = shalt.err (!%p2499_p9)
}
 0x87b   :  { %1459 = dma.vmem_to_hbm [thread:$0]  %s1457_s13, 32, %s2951_s3, [#allocation4]  }
 0x87c   :  { %2507 = dma.done.wait [#allocation4], 32  }
 0x87d   :  { %2508 = vsyncadd [#allocation4], 4294967264 }
 0x87e   :  { %1463 = vsyncpa [#allocation3], 1 }
 0x87f   :  { %1464 = vsyncpa [#allocation6], 1 }
 0x880   :  { %1465 = vsyncpa [#allocation4], 1 }

</bundles_post_ra>
